<compile_context>
chip_gen: v7x
topology: tpu7x:2x2x1
jax: 0.10.0
libtpu: 0.0.40
codegen_flags: <defaults>
</compile_context>

<pallas_src>
import functools

import jax
import jax.numpy as jnp
from jax.experimental import pallas as pl
from jax.experimental.pallas import tpu as pltpu

BN_EPS = 1e-5


def _silu(x):
    return x * jax.nn.sigmoid(x)


def _round_up(x, m):
    return ((x + m - 1) // m) * m


# ---------------------------------------------------------------------------
# Fused kernel: depthwise conv (+folded BN, SiLU) -> 1x1 conv (+folded BN, SiLU)
# One grid step == one group of G batch images (G*C == 8 sublanes when C < 8).
# All arrays keep the flattened, row-stride-Wp spatial axis (lane-dense,
# multiple of 128) as the last dimension.
# ---------------------------------------------------------------------------
def fused_dwconv_kernel(x_ref, dww_ref, dwb_ref, pww_ref, pwb_ref, o_ref,
                        *, K, Wp, Lp, use_mxu):
    # x_ref:   (1, GC, Ltot)   2D zero-padded images, flattened with row stride Wp
    # dww_ref: (GC, K*K)       depthwise weights (BN scale folded), tiled over G
    # dwb_ref: (GC, 1)         folded depthwise BN bias, tiled over G
    # pww_ref: (GCout, GC)     block-diagonal 1x1 weights (BN scale folded)
    # pwb_ref: (GCout, 1)      folded pointwise BN bias, tiled over G
    # o_ref:   (1, GCout, Lp)  lane-dense output slab (row-stride-Wp layout)
    GC = dww_ref.shape[0]
    GCout = pww_ref.shape[0]

    # ---- depthwise conv: K*K taps at constant lane offsets (no masks) --------
    acc = jnp.zeros((GC, Lp), jnp.float32)
    for kh in range(K):                                  # static unroll
        for kw in range(K):
            t = kh * K + kw
            off = kh * Wp + kw                           # constant flat tap offset
            xs = x_ref[0, :, off:off + Lp].astype(jnp.float32)  # windowed vld
            acc = acc + xs * dww_ref[:, t:t + 1]
    y = _silu(acc + dwb_ref[...])                        # (GC, Lp)

    # ---- pointwise 1x1 conv + folded BN + SiLU --------------------------------
    pwv = pww_ref[...]                                   # (GCout, GC)
    if use_mxu:
        # Real channel counts: push the contraction to the (otherwise idle) MXU.
        z = jnp.dot(pwv, y, preferred_element_type=jnp.float32)
    else:
        # Toy channel counts: exact-f32 VPU broadcast-MACs (GC is tiny).
        z = jnp.zeros((GCout, Lp), jnp.float32)
        for c in range(GC):                              # static unroll
            z = z + y[c:c + 1, :] * pwv[:, c:c + 1]
    z = _silu(z + pwb_ref[...])
    o_ref[0] = z.astype(o_ref.dtype)


def dwconv_forward(x_nchw, params, *, ksize, stride=1):
    """DWConv.forward — NCHW in / NCHW out, like the PyTorch module."""
    if stride != 1:
        # TODO(synk): stride > 1 needs a strided-tap (polyphase) path; only stride=1 is implemented.
        raise NotImplementedError("fused Pallas DWConv currently supports stride=1")
    N, C, H, W = x_nchw.shape
    K = ksize
    pad = (K - 1) // 2
    Cout = params["pw_w"].shape[1]

    G = max(1, 8 // C)                       # sublane packing (f32 vreg = 8 sublanes)
    N_pad = _round_up(N, G)
    Ngroups = N_pad // G
    Hp, Wp = H + 2 * pad, W + 2 * pad
    Lout = H * Wp                            # meaningful output length (row stride Wp)
    Lp = _round_up(Lout, 128)                # lane-dense output length
    max_off = (K - 1) * Wp + (K - 1)         # largest flat tap offset
    Ltot = _round_up(Lp + max_off, 128)      # input slab length (covers every tap)
    GC, GCout = G * C, G * Cout

    # ---- layout glue: real 2D zero padding, flatten with row stride Wp --------
    xp = jnp.pad(x_nchw, ((0, N_pad - N), (0, 0), (pad, pad), (pad, pad)))
    x_flat = jnp.pad(xp.reshape(N_pad, C, Hp * Wp),
                     ((0, 0), (0, 0), (0, Ltot - Hp * Wp)))
    x_flat = x_flat.reshape(Ngroups, GC, Ltot)           # pack G images per step

    # ---- fold BatchNorm into conv weights / biases; tile over packing G -------
    dw_scale = params["dw_gamma"] / jnp.sqrt(params["dw_var"] + BN_EPS)        # (C,)
    dw_w = (params["dw_w"] * dw_scale[None, None, :]).reshape(K * K, C).T       # (C, K*K)
    dw_b = (params["dw_beta"] - params["dw_mean"] * dw_scale)[:, None]          # (C, 1)
    dw_w = jnp.tile(dw_w, (G, 1))                                               # (GC, K*K)
    dw_b = jnp.tile(dw_b, (G, 1))                                               # (GC, 1)

    pw_scale = params["pw_gamma"] / jnp.sqrt(params["pw_var"] + BN_EPS)         # (Cout,)
    pw_w = (params["pw_w"] * pw_scale[None, :]).T                               # (Cout, C)
    pw_b = (params["pw_beta"] - params["pw_mean"] * pw_scale)[:, None]          # (Cout, 1)
    pw_w = jnp.kron(jnp.eye(G, dtype=pw_w.dtype), pw_w)                         # (GCout, GC) block-diag
    pw_b = jnp.tile(pw_b, (G, 1))                                               # (GCout, 1)

    use_mxu = C >= 8         # toy channel counts stay on the VPU (exact f32)

    # explicit scoped-VMEM budget: double-buffered in/out blocks + residents.
    in_blk = GC * Ltot * 4
    out_blk = GCout * Lp * 4
    wgt = (GC * K * K + GC + GCout * GC + GCout) * 4
    scratch = (2 * GC + 2 * GCout) * Lp * 4
    vmem_limit = int(min(max(2 * (in_blk + out_blk) + 2 * wgt + scratch + (2 << 20),
                             8 << 20), 96 << 20))

    out = pl.pallas_call(
        functools.partial(fused_dwconv_kernel, K=K, Wp=Wp, Lp=Lp, use_mxu=use_mxu),
        out_shape=jax.ShapeDtypeStruct((Ngroups, GCout, Lp), jnp.float32),
        grid=(Ngroups,),
        in_specs=[
            pl.BlockSpec((1, GC, Ltot), lambda n: (n, 0, 0)),
            pl.BlockSpec((GC, K * K), lambda n: (0, 0)),
            pl.BlockSpec((GC, 1), lambda n: (0, 0)),
            pl.BlockSpec((GCout, GC), lambda n: (0, 0)),
            pl.BlockSpec((GCout, 1), lambda n: (0, 0)),
        ],
        out_specs=pl.BlockSpec((1, GCout, Lp), lambda n: (n, 0, 0)),
        compiler_params=pltpu.CompilerParams(
            dimension_semantics=("parallel",),
            vmem_limit_bytes=vmem_limit),
    )(x_flat, dw_w, dw_b, pw_w, pw_b)
    # TODO(synk): for large H*W add an L-tile grid axis (tap halo via manual
    #   make_async_copy) so blocks stay under v7x's 64 MiB VMEM and both v7x
    #   TensorCores get work; whole-image blocks are fine at these toy shapes.
    # TODO(synk): on v5e carry x/out through HBM as bf16 (mem-bound there);
    #   kept f32 end-to-end here to preserve the 1e-4 tolerance.

    out = out.reshape(N_pad, Cout, Lp)[:N, :, :Lout]       # drop batch pad + lane tail
    return out.reshape(N, Cout, H, Wp)[:, :, :, :W]        # drop the Wp pad columns


# ---------------------------------------------------------------------------
# Pure-JAX reference (mirrors the PyTorch module with BN in inference form).
# ---------------------------------------------------------------------------
def dwconv_reference(x_nchw, params, *, ksize, stride=1):
    pad = (ksize - 1) // 2
    C = x_nchw.shape[1]
    # depthwise: (K,K,C) -> OIHW (C,1,K,K) with feature_group_count=C
    dw_w = jnp.transpose(params["dw_w"], (2, 0, 1))[:, None, :, :]
    y = jax.lax.conv_general_dilated(
        x_nchw, dw_w, (stride, stride), [(pad, pad), (pad, pad)],
        dimension_numbers=("NCHW", "OIHW", "NCHW"), feature_group_count=C)
    s = params["dw_gamma"] / jnp.sqrt(params["dw_var"] + BN_EPS)
    b = params["dw_beta"] - params["dw_mean"] * s
    y = y * s[None, :, None, None] + b[None, :, None, None]
    y = y * jax.nn.sigmoid(y)
    # pointwise: (C,Cout) -> OIHW (Cout,C,1,1)
    pw_w = jnp.transpose(params["pw_w"])[:, :, None, None]
    z = jax.lax.conv_general_dilated(
        y, pw_w, (1, 1), [(0, 0), (0, 0)],
        dimension_numbers=("NCHW", "OIHW", "NCHW"))
    s2 = params["pw_gamma"] / jnp.sqrt(params["pw_var"] + BN_EPS)
    b2 = params["pw_beta"] - params["pw_mean"] * s2
    z = z * s2[None, :, None, None] + b2[None, :, None, None]
    return z * jax.nn.sigmoid(z)


if __name__ == "__main__":
    # DWConv(in_channels=4, out_channels=8, ksize=3, stride=1, act='silu')
    N, Cin, Cout, H, W, K, S = 2, 4, 8, 16, 16, 3, 1

    key = jax.random.PRNGKey(0)
    ks = jax.random.split(key, 10)
    params = {
        # dconv: nn.Conv2d(Cin, Cin, K, groups=Cin) -> depthwise filter (K,K,Cin)
        "dw_w": 0.1 * jax.random.normal(ks[0], (K, K, Cin), jnp.float32),
        "dw_gamma": 1.0 + 0.1 * jax.random.normal(ks[1], (Cin,), jnp.float32),
        "dw_beta": 0.05 * jax.random.normal(ks[2], (Cin,), jnp.float32),
        "dw_mean": 0.02 * jax.random.normal(ks[3], (Cin,), jnp.float32),
        "dw_var": 1.0 + 0.1 * jnp.abs(jax.random.normal(ks[4], (Cin,), jnp.float32)),
        # pconv: nn.Conv2d(Cin, Cout, 1) -> (Cin, Cout) matmul weight
        "pw_w": 0.1 * jax.random.normal(ks[5], (Cin, Cout), jnp.float32),
        "pw_gamma": 1.0 + 0.1 * jax.random.normal(ks[6], (Cout,), jnp.float32),
        "pw_beta": 0.05 * jax.random.normal(ks[7], (Cout,), jnp.float32),
        "pw_mean": 0.02 * jax.random.normal(ks[8], (Cout,), jnp.float32),
        "pw_var": jnp.ones((Cout,), jnp.float32),
    }

    x = jax.random.normal(ks[9], (N, Cin, H, W), jnp.float32)

    out = jax.block_until_ready(dwconv_forward(x, params, ksize=K, stride=S))
    ref = jax.block_until_ready(dwconv_reference(x, params, ksize=K, stride=S))

    assert out.shape == (N, Cout, H, W), out.shape
    max_err = float(jnp.max(jnp.abs(out - ref)))
    assert jnp.allclose(out, ref, atol=1e-4, rtol=1e-4), max_err

    print("KERNEL_OK")
</pallas_src>

<mosaic_0001>
module attributes {stable_mosaic.version = 11 : i64} {
  func.func @fused_dwconv_kernel(%arg0: i32, %arg1: memref<1x8x512xf32, #tpu.memory_space<vmem>>, %arg2: memref<8x9xf32, #tpu.memory_space<vmem>>, %arg3: memref<8x1xf32, #tpu.memory_space<vmem>>, %arg4: memref<16x8xf32, #tpu.memory_space<vmem>>, %arg5: memref<16x1xf32, #tpu.memory_space<vmem>>, %arg6: memref<1x16x384xf32, #tpu.memory_space<vmem>>) attributes {dimension_semantics = [#tpu.dimension_semantics<parallel>], iteration_bounds = array<i64: 1>, scalar_prefetch = 0 : i64, scratch_operands = 0 : i64, tpu.core_type = #tpu.core_type<tc>, window_params = [{transform_indices = @transform_0, window_bounds = array<i64: 1, 8, 512>}, {pipeline_mode = #tpu.pipeline_mode<synchronous>, transform_indices = @transform_1, window_bounds = array<i64: 8, 9>}, {pipeline_mode = #tpu.pipeline_mode<synchronous>, transform_indices = @transform_2, window_bounds = array<i64: 8, 1>}, {pipeline_mode = #tpu.pipeline_mode<synchronous>, transform_indices = @transform_3, window_bounds = array<i64: 16, 8>}, {pipeline_mode = #tpu.pipeline_mode<synchronous>, transform_indices = @transform_4, window_bounds = array<i64: 16, 1>}, {transform_indices = @transform_5, window_bounds = array<i64: 1, 16, 384>}]} {
    %cst = arith.constant 0.000000e+00 : f32
    %0 = vector.broadcast %cst : f32 to vector<8x384xf32>
    %c0 = arith.constant 0 : index
    %c0_0 = arith.constant 0 : index
    %c0_1 = arith.constant 0 : index
    %1 = vector.load %arg1[%c0, %c0_0, %c0_1] : memref<1x8x512xf32, #tpu.memory_space<vmem>>, vector<1x8x384xf32>
    %2 = vector.shape_cast %1 : vector<1x8x384xf32> to vector<8x384xf32>
    %c0_2 = arith.constant 0 : index
    %c0_3 = arith.constant 0 : index
    %3 = vector.load %arg2[%c0_2, %c0_3] : memref<8x9xf32, #tpu.memory_space<vmem>>, vector<8x1xf32>
    %4 = vector.broadcast %3 : vector<8x1xf32> to vector<8x384xf32>
    %5 = arith.mulf %2, %4 : vector<8x384xf32>
    %6 = arith.addf %0, %5 : vector<8x384xf32>
    %c0_4 = arith.constant 0 : index
    %c0_5 = arith.constant 0 : index
    %c1 = arith.constant 1 : index
    %7 = vector.load %arg1[%c0_4, %c0_5, %c1] : memref<1x8x512xf32, #tpu.memory_space<vmem>>, vector<1x8x384xf32>
    %8 = vector.shape_cast %7 : vector<1x8x384xf32> to vector<8x384xf32>
    %c0_6 = arith.constant 0 : index
    %c1_7 = arith.constant 1 : index
    %9 = vector.load %arg2[%c0_6, %c1_7] : memref<8x9xf32, #tpu.memory_space<vmem>>, vector<8x1xf32>
    %10 = vector.broadcast %9 : vector<8x1xf32> to vector<8x384xf32>
    %11 = arith.mulf %8, %10 : vector<8x384xf32>
    %12 = arith.addf %6, %11 : vector<8x384xf32>
    %c0_8 = arith.constant 0 : index
    %c0_9 = arith.constant 0 : index
    %c2 = arith.constant 2 : index
    %13 = vector.load %arg1[%c0_8, %c0_9, %c2] : memref<1x8x512xf32, #tpu.memory_space<vmem>>, vector<1x8x384xf32>
    %14 = vector.shape_cast %13 : vector<1x8x384xf32> to vector<8x384xf32>
    %c0_10 = arith.constant 0 : index
    %c2_11 = arith.constant 2 : index
    %15 = vector.load %arg2[%c0_10, %c2_11] : memref<8x9xf32, #tpu.memory_space<vmem>>, vector<8x1xf32>
    %16 = vector.broadcast %15 : vector<8x1xf32> to vector<8x384xf32>
    %17 = arith.mulf %14, %16 : vector<8x384xf32>
    %18 = arith.addf %12, %17 : vector<8x384xf32>
    %c0_12 = arith.constant 0 : index
    %c0_13 = arith.constant 0 : index
    %c18 = arith.constant 18 : index
    %19 = vector.load %arg1[%c0_12, %c0_13, %c18] : memref<1x8x512xf32, #tpu.memory_space<vmem>>, vector<1x8x384xf32>
    %20 = vector.shape_cast %19 : vector<1x8x384xf32> to vector<8x384xf32>
    %c0_14 = arith.constant 0 : index
    %c3 = arith.constant 3 : index
    %21 = vector.load %arg2[%c0_14, %c3] : memref<8x9xf32, #tpu.memory_space<vmem>>, vector<8x1xf32>
    %22 = vector.broadcast %21 : vector<8x1xf32> to vector<8x384xf32>
    %23 = arith.mulf %20, %22 : vector<8x384xf32>
    %24 = arith.addf %18, %23 : vector<8x384xf32>
    %c0_15 = arith.constant 0 : index
    %c0_16 = arith.constant 0 : index
    %c19 = arith.constant 19 : index
    %25 = vector.load %arg1[%c0_15, %c0_16, %c19] : memref<1x8x512xf32, #tpu.memory_space<vmem>>, vector<1x8x384xf32>
    %26 = vector.shape_cast %25 : vector<1x8x384xf32> to vector<8x384xf32>
    %c0_17 = arith.constant 0 : index
    %c4 = arith.constant 4 : index
    %27 = vector.load %arg2[%c0_17, %c4] : memref<8x9xf32, #tpu.memory_space<vmem>>, vector<8x1xf32>
    %28 = vector.broadcast %27 : vector<8x1xf32> to vector<8x384xf32>
    %29 = arith.mulf %26, %28 : vector<8x384xf32>
    %30 = arith.addf %24, %29 : vector<8x384xf32>
    %c0_18 = arith.constant 0 : index
    %c0_19 = arith.constant 0 : index
    %c20 = arith.constant 20 : index
    %31 = vector.load %arg1[%c0_18, %c0_19, %c20] : memref<1x8x512xf32, #tpu.memory_space<vmem>>, vector<1x8x384xf32>
    %32 = vector.shape_cast %31 : vector<1x8x384xf32> to vector<8x384xf32>
    %c0_20 = arith.constant 0 : index
    %c5 = arith.constant 5 : index
    %33 = vector.load %arg2[%c0_20, %c5] : memref<8x9xf32, #tpu.memory_space<vmem>>, vector<8x1xf32>
    %34 = vector.broadcast %33 : vector<8x1xf32> to vector<8x384xf32>
    %35 = arith.mulf %32, %34 : vector<8x384xf32>
    %36 = arith.addf %30, %35 : vector<8x384xf32>
    %c0_21 = arith.constant 0 : index
    %c0_22 = arith.constant 0 : index
    %c36 = arith.constant 36 : index
    %37 = vector.load %arg1[%c0_21, %c0_22, %c36] : memref<1x8x512xf32, #tpu.memory_space<vmem>>, vector<1x8x384xf32>
    %38 = vector.shape_cast %37 : vector<1x8x384xf32> to vector<8x384xf32>
    %c0_23 = arith.constant 0 : index
    %c6 = arith.constant 6 : index
    %39 = vector.load %arg2[%c0_23, %c6] : memref<8x9xf32, #tpu.memory_space<vmem>>, vector<8x1xf32>
    %40 = vector.broadcast %39 : vector<8x1xf32> to vector<8x384xf32>
    %41 = arith.mulf %38, %40 : vector<8x384xf32>
    %42 = arith.addf %36, %41 : vector<8x384xf32>
    %c0_24 = arith.constant 0 : index
    %c0_25 = arith.constant 0 : index
    %c37 = arith.constant 37 : index
    %43 = vector.load %arg1[%c0_24, %c0_25, %c37] : memref<1x8x512xf32, #tpu.memory_space<vmem>>, vector<1x8x384xf32>
    %44 = vector.shape_cast %43 : vector<1x8x384xf32> to vector<8x384xf32>
    %c0_26 = arith.constant 0 : index
    %c7 = arith.constant 7 : index
    %45 = vector.load %arg2[%c0_26, %c7] : memref<8x9xf32, #tpu.memory_space<vmem>>, vector<8x1xf32>
    %46 = vector.broadcast %45 : vector<8x1xf32> to vector<8x384xf32>
    %47 = arith.mulf %44, %46 : vector<8x384xf32>
    %48 = arith.addf %42, %47 : vector<8x384xf32>
    %c0_27 = arith.constant 0 : index
    %c0_28 = arith.constant 0 : index
    %c38 = arith.constant 38 : index
    %49 = vector.load %arg1[%c0_27, %c0_28, %c38] : memref<1x8x512xf32, #tpu.memory_space<vmem>>, vector<1x8x384xf32>
    %50 = vector.shape_cast %49 : vector<1x8x384xf32> to vector<8x384xf32>
    %c0_29 = arith.constant 0 : index
    %c8 = arith.constant 8 : index
    %51 = vector.load %arg2[%c0_29, %c8] : memref<8x9xf32, #tpu.memory_space<vmem>>, vector<8x1xf32>
    %52 = vector.broadcast %51 : vector<8x1xf32> to vector<8x384xf32>
    %53 = arith.mulf %50, %52 : vector<8x384xf32>
    %54 = arith.addf %48, %53 : vector<8x384xf32>
    %c0_30 = arith.constant 0 : index
    %c0_31 = arith.constant 0 : index
    %55 = vector.load %arg3[%c0_30, %c0_31] : memref<8x1xf32, #tpu.memory_space<vmem>>, vector<8x1xf32>
    %56 = vector.broadcast %55 : vector<8x1xf32> to vector<8x384xf32>
    %57 = arith.addf %54, %56 : vector<8x384xf32>
    %58 = arith.negf %57 : vector<8x384xf32>
    %59 = math.exp %58 : vector<8x384xf32>
    %cst_32 = arith.constant 1.000000e+00 : f32
    %60 = vector.broadcast %cst_32 : f32 to vector<8x384xf32>
    %61 = arith.addf %60, %59 : vector<8x384xf32>
    %62 = arith.divf %60, %61 : vector<8x384xf32>
    %63 = arith.mulf %57, %62 : vector<8x384xf32>
    %c0_33 = arith.constant 0 : index
    %c0_34 = arith.constant 0 : index
    %64 = vector.load %arg4[%c0_33, %c0_34] : memref<16x8xf32, #tpu.memory_space<vmem>>, vector<16x8xf32>
    %cst_35 = arith.constant 0.000000e+00 : f32
    %65 = vector.broadcast %cst_35 : f32 to vector<16x384xf32>
    %66 = vector.extract_strided_slice %63 {offsets = [0, 0], sizes = [1, 384], strides = [1, 1]} : vector<8x384xf32> to vector<1x384xf32>
    %67 = vector.extract_strided_slice %64 {offsets = [0, 0], sizes = [16, 1], strides = [1, 1]} : vector<16x8xf32> to vector<16x1xf32>
    %68 = vector.broadcast %66 : vector<1x384xf32> to vector<16x384xf32>
    %69 = vector.broadcast %67 : vector<16x1xf32> to vector<16x384xf32>
    %70 = arith.mulf %68, %69 : vector<16x384xf32>
    %71 = arith.addf %65, %70 : vector<16x384xf32>
    %72 = vector.extract_strided_slice %63 {offsets = [1, 0], sizes = [1, 384], strides = [1, 1]} : vector<8x384xf32> to vector<1x384xf32>
    %73 = vector.extract_strided_slice %64 {offsets = [0, 1], sizes = [16, 1], strides = [1, 1]} : vector<16x8xf32> to vector<16x1xf32>
    %74 = vector.broadcast %72 : vector<1x384xf32> to vector<16x384xf32>
    %75 = vector.broadcast %73 : vector<16x1xf32> to vector<16x384xf32>
    %76 = arith.mulf %74, %75 : vector<16x384xf32>
    %77 = arith.addf %71, %76 : vector<16x384xf32>
    %78 = vector.extract_strided_slice %63 {offsets = [2, 0], sizes = [1, 384], strides = [1, 1]} : vector<8x384xf32> to vector<1x384xf32>
    %79 = vector.extract_strided_slice %64 {offsets = [0, 2], sizes = [16, 1], strides = [1, 1]} : vector<16x8xf32> to vector<16x1xf32>
    %80 = vector.broadcast %78 : vector<1x384xf32> to vector<16x384xf32>
    %81 = vector.broadcast %79 : vector<16x1xf32> to vector<16x384xf32>
    %82 = arith.mulf %80, %81 : vector<16x384xf32>
    %83 = arith.addf %77, %82 : vector<16x384xf32>
    %84 = vector.extract_strided_slice %63 {offsets = [3, 0], sizes = [1, 384], strides = [1, 1]} : vector<8x384xf32> to vector<1x384xf32>
    %85 = vector.extract_strided_slice %64 {offsets = [0, 3], sizes = [16, 1], strides = [1, 1]} : vector<16x8xf32> to vector<16x1xf32>
    %86 = vector.broadcast %84 : vector<1x384xf32> to vector<16x384xf32>
    %87 = vector.broadcast %85 : vector<16x1xf32> to vector<16x384xf32>
    %88 = arith.mulf %86, %87 : vector<16x384xf32>
    %89 = arith.addf %83, %88 : vector<16x384xf32>
    %90 = vector.extract_strided_slice %63 {offsets = [4, 0], sizes = [1, 384], strides = [1, 1]} : vector<8x384xf32> to vector<1x384xf32>
    %91 = vector.extract_strided_slice %64 {offsets = [0, 4], sizes = [16, 1], strides = [1, 1]} : vector<16x8xf32> to vector<16x1xf32>
    %92 = vector.broadcast %90 : vector<1x384xf32> to vector<16x384xf32>
    %93 = vector.broadcast %91 : vector<16x1xf32> to vector<16x384xf32>
    %94 = arith.mulf %92, %93 : vector<16x384xf32>
    %95 = arith.addf %89, %94 : vector<16x384xf32>
    %96 = vector.extract_strided_slice %63 {offsets = [5, 0], sizes = [1, 384], strides = [1, 1]} : vector<8x384xf32> to vector<1x384xf32>
    %97 = vector.extract_strided_slice %64 {offsets = [0, 5], sizes = [16, 1], strides = [1, 1]} : vector<16x8xf32> to vector<16x1xf32>
    %98 = vector.broadcast %96 : vector<1x384xf32> to vector<16x384xf32>
    %99 = vector.broadcast %97 : vector<16x1xf32> to vector<16x384xf32>
    %100 = arith.mulf %98, %99 : vector<16x384xf32>
    %101 = arith.addf %95, %100 : vector<16x384xf32>
    %102 = vector.extract_strided_slice %63 {offsets = [6, 0], sizes = [1, 384], strides = [1, 1]} : vector<8x384xf32> to vector<1x384xf32>
    %103 = vector.extract_strided_slice %64 {offsets = [0, 6], sizes = [16, 1], strides = [1, 1]} : vector<16x8xf32> to vector<16x1xf32>
    %104 = vector.broadcast %102 : vector<1x384xf32> to vector<16x384xf32>
    %105 = vector.broadcast %103 : vector<16x1xf32> to vector<16x384xf32>
    %106 = arith.mulf %104, %105 : vector<16x384xf32>
    %107 = arith.addf %101, %106 : vector<16x384xf32>
    %108 = vector.extract_strided_slice %63 {offsets = [7, 0], sizes = [1, 384], strides = [1, 1]} : vector<8x384xf32> to vector<1x384xf32>
    %109 = vector.extract_strided_slice %64 {offsets = [0, 7], sizes = [16, 1], strides = [1, 1]} : vector<16x8xf32> to vector<16x1xf32>
    %110 = vector.broadcast %108 : vector<1x384xf32> to vector<16x384xf32>
    %111 = vector.broadcast %109 : vector<16x1xf32> to vector<16x384xf32>
    %112 = arith.mulf %110, %111 : vector<16x384xf32>
    %113 = arith.addf %107, %112 : vector<16x384xf32>
    %c0_36 = arith.constant 0 : index
    %c0_37 = arith.constant 0 : index
    %114 = vector.load %arg5[%c0_36, %c0_37] : memref<16x1xf32, #tpu.memory_space<vmem>>, vector<16x1xf32>
    %115 = vector.broadcast %114 : vector<16x1xf32> to vector<16x384xf32>
    %116 = arith.addf %113, %115 : vector<16x384xf32>
    %117 = arith.negf %116 : vector<16x384xf32>
    %118 = math.exp %117 : vector<16x384xf32>
    %cst_38 = arith.constant 1.000000e+00 : f32
    %119 = vector.broadcast %cst_38 : f32 to vector<16x384xf32>
    %120 = arith.addf %119, %118 : vector<16x384xf32>
    %121 = arith.divf %119, %120 : vector<16x384xf32>
    %122 = arith.mulf %116, %121 : vector<16x384xf32>
    %c0_39 = arith.constant 0 : index
    %c0_40 = arith.constant 0 : index
    %c0_41 = arith.constant 0 : index
    %123 = vector.load %arg6[%c0_39, %c0_40, %c0_41] : memref<1x16x384xf32, #tpu.memory_space<vmem>>, vector<1x16x384xf32>
    %124 = vector.shape_cast %123 : vector<1x16x384xf32> to vector<16x384xf32>
    %125 = vector.shape_cast %122 : vector<16x384xf32> to vector<1x16x384xf32>
    tpu.vector_store %arg6[%c0_39, %c0_40, %c0_41], %125 {strides = array<i32>} : memref<1x16x384xf32, #tpu.memory_space<vmem>>, vector<1x16x384xf32>,
    return
  }
  func.func @transform_0(%arg0: i32) -> (i32, i32, i32) {
    %c0_i32 = arith.constant 0 : i32
    %c0_i32_0 = arith.constant 0 : i32
    %c0_i32_1 = arith.constant 0 : i32
    return %arg0, %c0_i32, %c0_i32_0 : i32, i32, i32
  }
  func.func @transform_1(%arg0: i32) -> (i32, i32) {
    %c0_i32 = arith.constant 0 : i32
    %c0_i32_0 = arith.constant 0 : i32
    %c0_i32_1 = arith.constant 0 : i32
    return %c0_i32, %c0_i32_0 : i32, i32
  }
  func.func @transform_2(%arg0: i32) -> (i32, i32) {
    %c0_i32 = arith.constant 0 : i32
    %c0_i32_0 = arith.constant 0 : i32
    %c0_i32_1 = arith.constant 0 : i32
    return %c0_i32, %c0_i32_0 : i32, i32
  }
  func.func @transform_3(%arg0: i32) -> (i32, i32) {
    %c0_i32 = arith.constant 0 : i32
    %c0_i32_0 = arith.constant 0 : i32
    %c0_i32_1 = arith.constant 0 : i32
    return %c0_i32, %c0_i32_0 : i32, i32
  }
  func.func @transform_4(%arg0: i32) -> (i32, i32) {
    %c0_i32 = arith.constant 0 : i32
    %c0_i32_0 = arith.constant 0 : i32
    %c0_i32_1 = arith.constant 0 : i32
    return %c0_i32, %c0_i32_0 : i32, i32
  }
  func.func @transform_5(%arg0: i32) -> (i32, i32, i32) {
    %c0_i32 = arith.constant 0 : i32
    %c0_i32_0 = arith.constant 0 : i32
    %c0_i32_1 = arith.constant 0 : i32
    return %arg0, %c0_i32, %c0_i32_0 : i32, i32, i32
  }
}

</mosaic_0001>

<bundles_post_ra>
// kernel: tpu_custom_call.1
= control target key start
LH: loop header
LB: loop body
LE: loop exit
PB: predicated region body
PF: predicated region fallthrough
CT: control target
= control target key end

     0   :  { %v765_v1 = vmov 1   ;;  %v766_v2 = vmov 3   ;;  %s1027_s0 = inlined_call_operand.vmem [shape: f32[1,8,512], index: 0, kind: input, shape index: {}]   ;;  %s1028_s1 = inlined_call_operand.vmem [shape: f32[8,9], index: 1, kind: input, shape index: {}]   ;;  %s1029_s2 = inlined_call_operand.vmem [shape: f32[8,1], index: 2, kind: input, shape index: {}]   ;;  %s1030_s3 = inlined_call_operand.vmem [shape: f32[16,8], index: 3, kind: input, shape index: {}]   ;;  %s1031_s4 = inlined_call_operand.vmem [shape: f32[16,1], index: 4, kind: input, shape index: {}]   ;;  %s1032_s5 = inlined_call_operand.hbm [shape: f32[1,16,384], index: 5, kind: output, shape index: {}]  }
   0x1   :  { %v24_v0 = vld [vmem:[%s1028_s1] sm:$0xff]  ;;  %681 = vset.pattern.permute.xlu0 %v765_v1  ;;  %683 = vset.pattern.permute.xlu1 %v766_v2 }
   0x2   :  { %41 = vperm.xlu0 %681, %v24_v0   ;;  %101 = vperm.xlu1 %683, %v24_v0  }
   0x3   :  { %10 = vsyncpa [#allocation3], 0  ;;  %v767_v3 = vmov 2   ;;  %v768_v4 = vmov 4   ;;  %v769_v5 = vmov 5   ;;  %v770_v6 = vmov 6  }
   0x4   :  { %v771_v7 = vmov 7   ;;  %v772_v8 = vmov 0   ;;  %v280_v9 = vld [vmem:[%s1029_s2] sm:$0xff]  ;;  %v773_v10 = vmov 8   ;;  %v840_v12 = vld [vmem:[%s1027_s0 + $0x10] sm:$0xff]  ;;  %v852_v17 = vld [vmem:[%s1027_s0 + $0x8] sm:$0xff] }
   0x5   :  { %v832_v11 = vld [vmem:[%s1030_s3] sm:$0xff]  ;;  %s774_s28 = smov 127   ;;  %v859_v21 = vld [vmem:[%s1027_s0 + $0x18] sm:$0xff]  ;;  %s775_s6 = smov 126   ;;  %v311_v55 = vld [vmem:[%s1030_s3 + $0x8] sm:$0xff]  ;;  %vm60_vm0 = vcmask 1039360  }
   0x6   :  { %682 = vset.pattern.permute.xlu0 %v767_v3  ;;  %684 = vset.pattern.permute.xlu1 %v768_v4  ;;  %v845_v13 = vld [vmem:[%s1027_s0] sm:$0xff]  ;;  %s776_s7 = smov 110   ;;  %s777_s0 = smov 109   ;;  %v571_v61 = vld [vmem:[%s1031_s4 + $0x8] sm:$0xff]  ;;  %vm90_vm1 = vcmask 1031168   ;;  %vm120_vm2 = vcmask 900096  }
   0x7   :  { %71 = vperm.xlu0 %682, %v24_v0   ;;  %131 = vperm.xlu1 %684, %v24_v0   ;;  %s778_s8 = smov 108   ;;  %s779_s9 = smov 92   ;;  %v570_v59 = vld [vmem:[%s1031_s4] sm:$0xff]  ;;  %vm150_vm3 = vcmask 891904   ;;  %vm180_vm4 = vcmask 883712   ;;  %vm210_vm5 = vcmask 752640  }
   0x8   :  { %s780_s10 = smov 91   ;;  %s781_s11 = smov 90   ;;  %vm240_vm6 = vcmask 744448   ;;  %vm270_vm7 = vcmask 736256  }
   0x9   :  { %s782_s4 = smov [#allocation2]  }
   0xa   :  { %s641_s17 = sshll.u32 %s782_s4, 4  ;;  %s642_s17 = int_to_ptr.vmem [resolvable:$true] %s641_s17 }
   0xb   :  { %685 = vset.pattern.permute.xlu1 %v769_v5  ;;  %686 = vset.pattern.permute.xlu0 %v770_v6  ;;  %s741_s18 = scalar_lea.vmem %s642_s17, 768  ;;  %p746_p1 = scmp.lt.s32.totalorder %s642_s17, %s642_s17 }
   0xc   :  { %161 = vperm.xlu1 %685, %v24_v0   ;;  %191 = vperm.xlu0 %686, %v24_v0   ;;  %p742_p0 = scmp.ne.s32.totalorder %s642_s17, %s741_s18  ;;  %p747_p2 = scmp.lt.s32.totalorder %s741_s18, %s741_s18 }
   0xe   :  { %p748_p3 = por %p747_p2, %p746_p1 }
  0x10   :  { %687 = vset.pattern.permute.xlu1 %v771_v7  ;;  %689 = vset.pattern.permute.xlu0 %v772_v8  ;;  %p749_p4 = pnand %p748_p3, %p742_p0 }
  0x11   :  { %221 = vperm.xlu1 %687, %v24_v0   ;;  %27 = vperm.xlu0 %689, %v24_v0  }
  0x15   :  { %688 = vset.pattern.permute.xlu1 %v773_v10  ;;  %283 = vperm.xlu0 %689, %v280_v9  }
  0x16   :  { %251 = vperm.xlu1 %688, %v24_v0  }
  0x1a   :  { %690 = vset.pattern.permute.xlu1 %v772_v8 }
  0x1b   :  { %326 = vperm.xlu1 %690, %v832_v11  }
  0x1f   :  { %691 = vset.pattern.permute.xlu1 %v765_v1 }
  0x81   :  { %v42_v14 = vpop.permute.xlu0 %41  ;;  %v102_v24 = vpop.permute.xlu1 %101 }
  0x82   :  { %v46_v15 = vmul.f32 %v42_v14, %v840_v12  ;;  %v44_v16 = vmul.f32 %v42_v14, %v845_v13  ;;  %v45_v19 = vmul.f32 %v42_v14, %v852_v17  ;;  %v47_v23 = vmul.f32 %v42_v14, %v859_v21 }
  0x83   :  { %v104_v26 = vmul.f32 %v102_v24, %v845_v13  ;;  %v106_v27 = vmul.f32 %v102_v24, %v840_v12  ;;  %v105_v30 = vmul.f32 %v102_v24, %v852_v17  ;;  %v107_v33 = vmul.f32 %v102_v24, %v859_v21 }
  0x84   :  { %56 = vrot.lane.b32.xlu0 %v46_v15, %s774_s28  ;;  %52 = vrot.lane.b32.xlu1 %v44_v16, %s774_s28 }
  0x86   :  { %v72_v18 = vpop.permute.xlu0 %71  ;;  %v132_v29 = vpop.permute.xlu1 %131 }
  0x87   :  { %v74_v20 = vmul.f32 %v72_v18, %v845_v13  ;;  %v76_v22 = vmul.f32 %v72_v18, %v840_v12  ;;  %v75_v25 = vmul.f32 %v72_v18, %v852_v17  ;;  %v77_v28 = vmul.f32 %v72_v18, %v859_v21 }
  0x88   :  { %54 = vrot.lane.b32.xlu1 %v45_v19, %s774_s28  ;;  %v134_v31 = vmul.f32 %v132_v29, %v845_v13  ;;  %v136_v32 = vmul.f32 %v132_v29, %v840_v12  ;;  %v135_v35 = vmul.f32 %v132_v29, %v852_v17  ;;  %v137_v38 = vmul.f32 %v132_v29, %v859_v21 }
  0x89   :  { %82 = vrot.lane.b32.xlu0 %v74_v20, %s775_s6 }
  0x8b   :  { %v162_v34 = vpop.permute.xlu1 %161  ;;  %v192_v39 = vpop.permute.xlu0 %191 }
  0x8c   :  { %58 = vrot.lane.b32.xlu1 %v47_v23, %s774_s28  ;;  %v164_v36 = vmul.f32 %v162_v34, %v845_v13  ;;  %v166_v37 = vmul.f32 %v162_v34, %v840_v12  ;;  %v165_v40 = vmul.f32 %v162_v34, %v852_v17  ;;  %v194_v41 = vmul.f32 %v192_v39, %v845_v13 }
  0x8d   :  { %86 = vrot.lane.b32.xlu0 %v76_v22, %s775_s6  ;;  %v196_v42 = vmul.f32 %v192_v39, %v840_v12  ;;  %v167_v43 = vmul.f32 %v162_v34, %v859_v21  ;;  %v195_v45 = vmul.f32 %v192_v39, %v852_v17  ;;  %v197_v48 = vmul.f32 %v192_v39, %v859_v21 }
  0x90   :  { %84 = vrot.lane.b32.xlu1 %v75_v25, %s775_s6  ;;  %v222_v44 = vpop.permute.xlu1 %221  ;;  %v28_v57 = vpop.permute.xlu0 %27 }
  0x91   :  { %112 = vrot.lane.b32.xlu0 %v104_v26, %s776_s7  ;;  %v225_v46 = vmul.f32 %v222_v44, %v852_v17  ;;  %v227_v47 = vmul.f32 %v222_v44, %v859_v21  ;;  %v224_v50 = vmul.f32 %v222_v44, %v845_v13  ;;  %v226_v53 = vmul.f32 %v222_v44, %v840_v12 }
  0x92   :  { %v30_v23 = vmul.f32 %v845_v13, %v28_v57  ;;  %v32_v29 = vmul.f32 %v840_v12, %v28_v57 }
  0x94   :  { %88 = vrot.lane.b32.xlu1 %v77_v28, %s775_s6  ;;  %v916_v60 = vpop.permute.xlu0 %283  ;;  %v31_v28 = vmul.f32 %v852_v17, %v28_v57 }
  0x95   :  { %116 = vrot.lane.b32.xlu0 %v106_v27, %s776_s7  ;;  %v252_v49 = vpop.permute.xlu1 %251 }
  0x96   :  { %v255_v51 = vmul.f32 %v252_v49, %v852_v17  ;;  %v257_v52 = vmul.f32 %v252_v49, %v859_v21  ;;  %v254_v54 = vmul.f32 %v252_v49, %v845_v13  ;;  %v256_v56 = vmul.f32 %v252_v49, %v840_v12 }
  0x98   :  { %114 = vrot.lane.b32.xlu1 %v105_v30, %s776_s7 }
  0x99   :  { %142 = vrot.lane.b32.xlu0 %v134_v31, %s777_s0 }
  0x9a   :  { %v911_v58 = vpop.permute.xlu1 %326 }
  0x9c   :  { %118 = vrot.lane.b32.xlu1 %v107_v33, %s776_s7 }
  0x9d   :  { %146 = vrot.lane.b32.xlu0 %v136_v32, %s777_s0 }
  0xa0   :  { %144 = vrot.lane.b32.xlu1 %v135_v35, %s777_s0 }
  0xa1   :  { %172 = vrot.lane.b32.xlu0 %v164_v36, %s778_s8 }
  0xa4   :  { %148 = vrot.lane.b32.xlu1 %v137_v38, %s777_s0 }
  0xa5   :  { %176 = vrot.lane.b32.xlu0 %v166_v37, %s778_s8 }
  0xa8   :  { %174 = vrot.lane.b32.xlu1 %v165_v40, %s778_s8 }
  0xa9   :  { %202 = vrot.lane.b32.xlu0 %v194_v41, %s779_s9 }
  0xac   :  { %178 = vrot.lane.b32.xlu1 %v167_v43, %s778_s8 }
  0xad   :  { %206 = vrot.lane.b32.xlu0 %v196_v42, %s779_s9 }
  0xb0   :  { %204 = vrot.lane.b32.xlu1 %v195_v45, %s779_s9 }
  0xb1   :  { %234 = vrot.lane.b32.xlu0 %v225_v46, %s780_s10 }
  0xb4   :  { %208 = vrot.lane.b32.xlu1 %v197_v48, %s779_s9 }
  0xb5   :  { %238 = vrot.lane.b32.xlu0 %v227_v47, %s780_s10 }
  0xb8   :  { %232 = vrot.lane.b32.xlu1 %v224_v50, %s780_s10 }
  0xb9   :  { %264 = vrot.lane.b32.xlu0 %v255_v51, %s781_s11 }
  0xbc   :  { %236 = vrot.lane.b32.xlu1 %v226_v53, %s780_s10 }
  0xbd   :  { %268 = vrot.lane.b32.xlu0 %v257_v52, %s781_s11 }
  0xc0   :  { %262 = vrot.lane.b32.xlu1 %v254_v54, %s781_s11 }
  0xc1   :  { %331 = vperm.xlu0 %689, %v311_v55  }
  0xc4   :  { %266 = vrot.lane.b32.xlu1 %v256_v56, %s781_s11 }
  0xc5   :  { %692 = vset.pattern.permute.xlu0 %v765_v1 }
  0xc6   :  { %363 = vperm.xlu0 %692, %v311_v55  }
  0xc8   :  { %359 = vperm.xlu1 %691, %v832_v11  }
  0xca   :  { %694 = vset.pattern.permute.xlu0 %v766_v2 }
  0xcb   :  { %423 = vperm.xlu0 %694, %v832_v11  }
  0xcc   :  { %693 = vset.pattern.permute.xlu1 %v767_v3 }
  0xcd   :  { %391 = vperm.xlu1 %693, %v832_v11  }
  0xcf   :  { %697 = vset.pattern.permute.xlu0 %v768_v4 }
  0xd0   :  { %459 = vperm.xlu0 %697, %v311_v55  }
  0xd1   :  { %395 = vperm.xlu1 %693, %v311_v55  }
  0xd4   :  { %699 = vset.pattern.permute.xlu0 %v770_v6 }
  0xd5   :  { %695 = vset.pattern.permute.xlu1 %v766_v2  ;;  %519 = vperm.xlu0 %699, %v832_v11  }
  0xd6   :  { %427 = vperm.xlu1 %695, %v311_v55  }
  0xd9   :  { %702 = vset.pattern.permute.xlu0 %v771_v7 }
  0xda   :  { %696 = vset.pattern.permute.xlu1 %v768_v4  ;;  %555 = vperm.xlu0 %702, %v311_v55  }
  0xdb   :  { %455 = vperm.xlu1 %696, %v832_v11  }
  0xde   :  { %704 = vset.pattern.permute.xlu0 %v772_v8 }
  0xdf   :  { %698 = vset.pattern.permute.xlu1 %v769_v5 }
  0xe0   :  { %487 = vperm.xlu1 %698, %v832_v11  }
  0xe4   :  { %491 = vperm.xlu1 %698, %v311_v55  }
  0xe8   :  { %700 = vset.pattern.permute.xlu1 %v770_v6 }
  0xe9   :  { %523 = vperm.xlu1 %700, %v311_v55  }
  0xed   :  { %701 = vset.pattern.permute.xlu1 %v771_v7 }
  0xee   :  { %551 = vperm.xlu1 %701, %v832_v11  }
  0xf2   :  { %703 = vset.pattern.permute.xlu1 %v772_v8 }
  0xf3   :  { %574 = vperm.xlu1 %703, %v570_v59  }
  0xf6   :  { %v53_v62 = vpop.permute.xlu1 %52  ;;  %v57_v63 = vpop.permute.xlu0 %56 }
  0xf7   :  { %579 = vperm.xlu1 %703, %v571_v61  }
  0xfa   :  { %v55_v0 = vpop.permute.xlu1 %54 }
  0xfb   :  { %v83_v1 = vpop.permute.xlu0 %82  ;;  %v61_v25 = vsel %vm60_vm0, %v53_v62, %v55_v0  ;;  %v62_v32 = vsel %vm60_vm0, %v55_v0, %v57_v63 }
  0xfc   :  { %v67_v30 = vadd.f32 %v61_v25, %v30_v23  ;;  %v68_v38 = vadd.f32 %v62_v32, %v31_v28  ;;  %v312_v32 = vlaneseq }
  0xfe   :  { %v59_v2 = vpop.permute.xlu1 %58 }
  0xff   :  { %v87_v3 = vpop.permute.xlu0 %86  ;;  %v63_v33 = vsel %vm60_vm0, %v57_v63, %v59_v2 }
 0x100   :  { %v69_v39 = vadd.f32 %v63_v33, %v32_v29 }
 0x102   :  { %v85_v4 = vpop.permute.xlu1 %84 }
 0x103   :  { %v113_v5 = vpop.permute.xlu0 %112  ;;  %v91_v27 = vsel %vm90_vm1, %v83_v1, %v85_v4  ;;  %v92_v13 = vsel %vm90_vm1, %v85_v4, %v87_v3 }
 0x104   :  { %v97_v35 = vadd.f32 %v91_v27, %v67_v30  ;;  %v98_v44 = vadd.f32 %v92_v13, %v68_v38  ;;  %v313_v13 = vshrl.u32 %v312_v32, 7 }
 0x106   :  { %v89_v6 = vpop.permute.xlu1 %88  ;;  %v314_v38 = vsub.s32 0, %v313_v13 }
 0x107   :  { %v117_v7 = vpop.permute.xlu0 %116  ;;  %v93_v36 = vsel %vm90_vm1, %v87_v3, %v89_v6 }
 0x108   :  { %v99_v45 = vadd.f32 %v93_v36, %v69_v39 }
 0x10a   :  { %v115_v9 = vpop.permute.xlu1 %114 }
 0x10b   :  { %v143_v10 = vpop.permute.xlu0 %142  ;;  %v121_v34 = vsel %vm120_vm2, %v113_v5, %v115_v9  ;;  %v122_v41 = vsel %vm120_vm2, %v115_v9, %v117_v7 }
 0x10c   :  { %v127_v17 = vadd.f32 %v121_v34, %v97_v35  ;;  %v128_v50 = vadd.f32 %v122_v41, %v98_v44  ;;  %v380_v41 = vsub.s32 2, %v313_v13 }
 0x10e   :  { %v119_v11 = vpop.permute.xlu1 %118 }
 0x10f   :  { %v147_v8 = vpop.permute.xlu0 %146  ;;  %v123_v42 = vsel %vm120_vm2, %v117_v7, %v119_v11 }
 0x110   :  { %v129_v51 = vadd.f32 %v123_v42, %v99_v45  ;;  %v412_v42 = vsub.s32 3, %v313_v13 }
 0x112   :  { %v145_v14 = vpop.permute.xlu1 %144 }
 0x113   :  { %v173_v15 = vpop.permute.xlu0 %172  ;;  %v151_v37 = vsel %vm150_vm3, %v143_v10, %v145_v14  ;;  %v152_v47 = vsel %vm150_vm3, %v145_v14, %v147_v8 }
 0x114   :  { %v157_v46 = vadd.f32 %v151_v37, %v127_v17  ;;  %v158_v57 = vadd.f32 %v152_v47, %v128_v50 }
 0x116   :  { %v149_v16 = vpop.permute.xlu1 %148 }
 0x117   :  { %v177_v18 = vpop.permute.xlu0 %176  ;;  %v153_v48 = vsel %vm150_vm3, %v147_v8, %v149_v16 }
 0x118   :  { %v159_v59 = vadd.f32 %v153_v48, %v129_v51  ;;  %v957_v48 = vsub.s32 6, %v313_v13 }
 0x11a   :  { %v175_v19 = vpop.permute.xlu1 %174 }
 0x11b   :  { %v203_v20 = vpop.permute.xlu0 %202  ;;  %v181_v43 = vsel %vm180_vm4, %v173_v15, %v175_v19  ;;  %v182_v54 = vsel %vm180_vm4, %v175_v19, %v177_v18 }
 0x11c   :  { %v187_v52 = vadd.f32 %v181_v43, %v157_v46  ;;  %v188_v1 = vadd.f32 %v182_v54, %v158_v57  ;;  %v444_v46 = vsub.s32 4, %v313_v13  ;;  %v964_v54 = vsub.s32 5, %v313_v13 }
 0x11e   :  { %v179_v21 = vpop.permute.xlu1 %178 }
 0x11f   :  { %v207_v22 = vpop.permute.xlu0 %206  ;;  %v183_v55 = vsel %vm180_vm4, %v177_v18, %v179_v21 }
 0x120   :  { %v189_v2 = vadd.f32 %v183_v55, %v159_v59 }
 0x122   :  { %v205_v24 = vpop.permute.xlu1 %204 }
 0x123   :  { %v235_v26 = vpop.permute.xlu0 %234  ;;  %v211_v49 = vsel %vm210_vm5, %v203_v20, %v205_v24  ;;  %v212_v63 = vsel %vm210_vm5, %v205_v24, %v207_v22 }
 0x124   :  { %v217_v61 = vadd.f32 %v211_v49, %v187_v52  ;;  %v218_v9 = vadd.f32 %v212_v63, %v188_v1  ;;  %v959_v49 = vsub.s32 7, %v313_v13 }
 0x126   :  { %v209_v31 = vpop.permute.xlu1 %208 }
 0x127   :  { %v239_v40 = vpop.permute.xlu0 %238  ;;  %v213_v0 = vsel %vm210_vm5, %v207_v22, %v209_v31 }
 0x128   :  { %v219_v10 = vadd.f32 %v213_v0, %v189_v2 }
 0x12a   :  { %v233_v12 = vpop.permute.xlu1 %232 }
 0x12b   :  { %v241_v56 = vsel %vm240_vm6, %v233_v12, %v235_v26  ;;  %v265_v62 = vpop.permute.xlu0 %264 }
 0x12c   :  { %v247_v3 = vadd.f32 %v241_v56, %v217_v61 }
 0x12e   :  { %v237_v53 = vpop.permute.xlu1 %236 }
 0x12f   :  { %v242_v5 = vsel %vm240_vm6, %v235_v26, %v237_v53  ;;  %v243_v6 = vsel %vm240_vm6, %v237_v53, %v239_v40  ;;  %v269_v16 = vpop.permute.xlu0 %268 }
 0x130   :  { %v248_v8 = vadd.f32 %v242_v5, %v218_v9  ;;  %v249_v14 = vadd.f32 %v243_v6, %v219_v10 }
 0x132   :  { %v263_v4 = vpop.permute.xlu1 %262 }
 0x133   :  { %v271_v7 = vsel %vm270_vm7, %v263_v4, %v265_v62 }
 0x134   :  { %v277_v11 = vadd.f32 %v271_v7, %v247_v3 }
 0x136   :  { %v286_v15 = vadd.f32 %v916_v60, %v277_v11  ;;  %v267_v18 = vpop.permute.xlu1 %266 }
 0x137   :  { %v272_v19 = vsel %vm270_vm7, %v265_v62, %v267_v18  ;;  %v273_v20 = vsel %vm270_vm7, %v267_v18, %v269_v16 }
 0x138   :  { %v652_v21 = vmul.f32 -1.442695, %v286_v15  ;;  %v278_v22 = vadd.f32 %v272_v19, %v248_v8  ;;  %v279_v23 = vadd.f32 %v273_v20, %v249_v14 }
 0x13a   :  { %705 = vpow2.f32 %v652_v21  ;;  %v287_v24 = vadd.f32 %v916_v60, %v278_v22  ;;  %v288_v25 = vadd.f32 %v916_v60, %v279_v23  ;;  %v348_v60 = vsub.s32 1, %v313_v13 }
 0x13c   :  { %v653_v26 = vmul.f32 -1.442695, %v287_v24  ;;  %v654_v27 = vmul.f32 -1.442695, %v288_v25 }
 0x13e   :  { %707 = vpow2.f32 %v653_v26 }
 0x13f   :  { %709 = vpow2.f32 %v654_v27 }
 0x140   :  { %v332_v37 = vpop.permute.xlu0 %331 }
 0x144   :  { %v706_v28 = vpop.eup %705 }
 0x145   :  { %v298_v29 = vadd.f32 1.0, %v706_v28  ;;  %v364_v12 = vpop.permute.xlu0 %363 }
 0x147   :  { %711 = vrcp.f32 %v298_v29  ;;  %v360_v30 = vpop.permute.xlu1 %359 }
 0x148   :  { %v708_v31 = vpop.eup %707 }
 0x149   :  { %v710_v33 = vpop.eup %709  ;;  %v299_v34 = vadd.f32 1.0, %v708_v31 }
 0x14a   :  { %v300_v35 = vadd.f32 1.0, %v710_v33  ;;  %v424_v59 = vpop.permute.xlu0 %423 }
 0x14b   :  { %713 = vrcp.f32 %v299_v34 }
 0x14c   :  { %715 = vrcp.f32 %v300_v35  ;;  %v392_v36 = vpop.permute.xlu1 %391 }
 0x14f   :  { %v460_v26 = vpop.permute.xlu0 %459 }
 0x150   :  { %v949_v39 = vpop.permute.xlu1 %395 }
 0x151   :  { %v712_v17 = vpop.eup %711 }
 0x152   :  { %v951_v40 = vmul.f32 %v712_v17, %v286_v15 }
 0x154   :  { %v315_v43 = vrot.slane %v951_v40, %v314_v38  ;;  %v349_v44 = vrot.slane %v951_v40, %v348_v60  ;;  %v381_v57 = vrot.slane %v951_v40, %v380_v41  ;;  %v413_v61 = vrot.slane %v951_v40, %v412_v42 }
 0x155   :  { %v714_v45 = vpop.eup %713  ;;  %v955_v47 = vpop.permute.xlu1 %427  ;;  %v445_v20 = vrot.slane %v951_v40, %v444_v46  ;;  %v981_v21 = vrot.slane %v951_v40, %v957_v48  ;;  %v988_v33 = vrot.slane %v951_v40, %v959_v49 }
 0x156   :  { %v716_v50 = vpop.eup %715  ;;  %v961_v51 = vmul.f32 %v714_v45, %v287_v24  ;;  %v334_v52 = vmul.f32 %v911_v58, %v315_v43  ;;  %v366_v53 = vmul.f32 %v360_v30, %v349_v44  ;;  %v337_v56 = vmul.f32 %v332_v37, %v315_v43 }
 0x157   :  { %v966_v55 = vmul.f32 %v716_v50, %v288_v25  ;;  %v369_v1 = vmul.f32 %v364_v12, %v349_v44  ;;  %v398_v19 = vmul.f32 %v392_v36, %v381_v57  ;;  %v401_v32 = vmul.f32 %v949_v39, %v381_v57 }
 0x158   :  { %v319_v62 = vrot.slane %v961_v51, %v314_v38  ;;  %v353_v63 = vrot.slane %v961_v51, %v348_v60  ;;  %v372_v0 = vadd.f32 %v366_v53, %v334_v52  ;;  %v385_v4 = vrot.slane %v961_v51, %v380_v41 }
 0x159   :  { %v323_v2 = vrot.slane %v966_v55, %v314_v38  ;;  %v357_v3 = vrot.slane %v966_v55, %v348_v60  ;;  %v389_v5 = vrot.slane %v966_v55, %v380_v41  ;;  %v375_v23 = vadd.f32 %v369_v1, %v337_v56  ;;  %v520_v56 = vpop.permute.xlu0 %519 }
 0x15a   :  { %v338_v6 = vmul.f32 %v332_v37, %v319_v62  ;;  %v335_v7 = vmul.f32 %v911_v58, %v319_v62  ;;  %v367_v9 = vmul.f32 %v360_v30, %v353_v63  ;;  %v370_v10 = vmul.f32 %v364_v12, %v353_v63  ;;  %v456_v11 = vpop.permute.xlu1 %455 }
 0x15b   :  { %v339_v8 = vmul.f32 %v332_v37, %v323_v2  ;;  %v336_v14 = vmul.f32 %v911_v58, %v323_v2  ;;  %v368_v15 = vmul.f32 %v360_v30, %v357_v3  ;;  %v371_v16 = vmul.f32 %v364_v12, %v357_v3 }
 0x15c   :  { %v373_v18 = vadd.f32 %v367_v9, %v335_v7  ;;  %v399_v24 = vmul.f32 %v392_v36, %v385_v4  ;;  %v417_v25 = vrot.slane %v961_v51, %v412_v42  ;;  %v376_v27 = vadd.f32 %v370_v10, %v338_v6 }
 0x15d   :  { %v374_v22 = vadd.f32 %v368_v15, %v336_v14  ;;  %v400_v28 = vmul.f32 %v392_v36, %v389_v5  ;;  %v404_v29 = vadd.f32 %v398_v19, %v372_v0  ;;  %v421_v58 = vrot.slane %v966_v55, %v412_v42 }
 0x15e   :  { %v377_v30 = vadd.f32 %v371_v16, %v339_v8  ;;  %v405_v31 = vadd.f32 %v399_v24, %v373_v18  ;;  %v430_v13 = vmul.f32 %v424_v59, %v413_v61  ;;  %v402_v37 = vmul.f32 %v949_v39, %v385_v4 }
 0x15f   :  { %v488_v34 = vpop.permute.xlu1 %487  ;;  %v406_v35 = vadd.f32 %v400_v28, %v374_v22  ;;  %v449_v38 = vrot.slane %v961_v51, %v444_v46  ;;  %v431_v60 = vmul.f32 %v424_v59, %v417_v25  ;;  %v403_v36 = vmul.f32 %v949_v39, %v389_v5 }
 0x160   :  { %v407_v17 = vadd.f32 %v401_v32, %v375_v23  ;;  %v453_v12 = vrot.slane %v966_v55, %v444_v46  ;;  %v432_v41 = vmul.f32 %v424_v59, %v421_v58  ;;  %v436_v42 = vadd.f32 %v430_v13, %v404_v29 }
 0x161   :  { %v408_v43 = vadd.f32 %v402_v37, %v376_v27  ;;  %v477_v44 = vrot.slane %v951_v40, %v964_v54  ;;  %v437_v45 = vadd.f32 %v431_v60, %v405_v31  ;;  %v409_v50 = vadd.f32 %v403_v36, %v377_v30  ;;  %v556_v60 = vpop.permute.xlu0 %555 }
 0x162   :  { %v465_v52 = vmul.f32 %v460_v26, %v445_v20  ;;  %v433_v53 = vmul.f32 %v955_v47, %v413_v61  ;;  %v438_v62 = vadd.f32 %v432_v41, %v406_v35  ;;  %v466_v63 = vmul.f32 %v460_v26, %v449_v38 }
 0x163   :  { %v492_v57 = vpop.permute.xlu1 %491  ;;  %v467_v0 = vmul.f32 %v460_v26, %v453_v12  ;;  %v434_v39 = vmul.f32 %v955_v47, %v417_v25  ;;  %v435_v46 = vmul.f32 %v955_v47, %v421_v58  ;;  %v513_v1 = vrot.slane %v961_v51, %v957_v48 }
 0x164   :  { %v439_v59 = vadd.f32 %v433_v53, %v407_v17  ;;  %v517_v40 = vrot.slane %v966_v55, %v957_v48  ;;  %v526_v3 = vmul.f32 %v520_v56, %v981_v21  ;;  %v462_v61 = vmul.f32 %v456_v11, %v445_v20 }
 0x165   :  { %v440_v2 = vadd.f32 %v434_v39, %v408_v43  ;;  %v463_v4 = vmul.f32 %v456_v11, %v449_v38  ;;  %v545_v5 = vrot.slane %v961_v51, %v959_v49  ;;  %v464_v6 = vmul.f32 %v456_v11, %v453_v12 }
 0x166   :  { %v481_v7 = vrot.slane %v961_v51, %v964_v54  ;;  %v485_v47 = vrot.slane %v966_v55, %v964_v54  ;;  %v441_v9 = vadd.f32 %v435_v46, %v409_v50  ;;  %v468_v10 = vadd.f32 %v462_v61, %v436_v42 }
 0x167   :  { %v469_v8 = vadd.f32 %v463_v4, %v437_v45  ;;  %v494_v14 = vmul.f32 %v488_v34, %v477_v44  ;;  %v527_v15 = vmul.f32 %v520_v56, %v513_v1  ;;  %v470_v16 = vadd.f32 %v464_v6, %v438_v62 }
 0x168   :  { %v524_v48 = vpop.permute.xlu1 %523  ;;  %v495_v18 = vmul.f32 %v488_v34, %v481_v7  ;;  %v496_v19 = vmul.f32 %v488_v34, %v485_v47  ;;  %v471_v22 = vadd.f32 %v465_v52, %v439_v59  ;;  %v497_v23 = vmul.f32 %v492_v57, %v477_v44 }
 0x169   :  { %v500_v20 = vadd.f32 %v494_v14, %v468_v10  ;;  %v498_v24 = vmul.f32 %v492_v57, %v481_v7  ;;  %v472_v26 = vadd.f32 %v466_v63, %v440_v2  ;;  %v499_v51 = vmul.f32 %v492_v57, %v485_v47 }
 0x16a   :  { %v501_v11 = vadd.f32 %v495_v18, %v469_v8  ;;  %v502_v25 = vadd.f32 %v496_v19, %v470_v16  ;;  %v528_v27 = vmul.f32 %v520_v56, %v517_v40  ;;  %v549_v54 = vrot.slane %v966_v55, %v959_v49 }
 0x16b   :  { %v529_v28 = vmul.f32 %v524_v48, %v981_v21  ;;  %v530_v29 = vmul.f32 %v524_v48, %v513_v1  ;;  %v473_v58 = vadd.f32 %v467_v0, %v441_v9  ;;  %v503_v30 = vadd.f32 %v497_v23, %v471_v22 }
 0x16c   :  { %v504_v31 = vadd.f32 %v498_v24, %v472_v26  ;;  %v531_v32 = vmul.f32 %v524_v48, %v517_v40  ;;  %v532_v37 = vadd.f32 %v526_v3, %v500_v20  ;;  %v533_v38 = vadd.f32 %v527_v15, %v501_v11 }
 0x16d   :  { %v552_v34 = vpop.permute.xlu1 %551  ;;  %v505_v36 = vadd.f32 %v499_v51, %v473_v58  ;;  %v534_v12 = vadd.f32 %v528_v27, %v502_v25  ;;  %v535_v41 = vadd.f32 %v529_v28, %v503_v30  ;;  %v561_v44 = vmul.f32 %v556_v60, %v988_v33 }
 0x16e   :  { %v558_v35 = vmul.f32 %v552_v34, %v988_v33  ;;  %v559_v13 = vmul.f32 %v552_v34, %v545_v5  ;;  %v560_v17 = vmul.f32 %v552_v34, %v549_v54  ;;  %v536_v42 = vadd.f32 %v530_v29, %v504_v31 }
 0x16f   :  { %v537_v21 = vadd.f32 %v531_v32, %v505_v36  ;;  %v562_v45 = vmul.f32 %v556_v60, %v545_v5  ;;  %v563_v52 = vmul.f32 %v556_v60, %v549_v54  ;;  %v567_v62 = vadd.f32 %v561_v44, %v535_v41 }
 0x170   :  { %v564_v49 = vadd.f32 %v558_v35, %v532_v37  ;;  %v565_v55 = vadd.f32 %v559_v13, %v533_v38  ;;  %v566_v43 = vadd.f32 %v560_v17, %v534_v12 }
 0x171   :  { %v568_v63 = vadd.f32 %v562_v45, %v536_v42  ;;  %v569_v59 = vadd.f32 %v563_v52, %v537_v21 }
 0x172   :  { %v575_v50 = vpop.permute.xlu1 %574 }
 0x173   :  { %v582_v53 = vadd.f32 %v575_v50, %v564_v49  ;;  %v583_v56 = vadd.f32 %v575_v50, %v565_v55  ;;  %v584_v57 = vadd.f32 %v575_v50, %v566_v43 }
 0x175   :  { %v655_v0 = vmul.f32 -1.442695, %v582_v53  ;;  %v656_v39 = vmul.f32 -1.442695, %v583_v56  ;;  %v657_v46 = vmul.f32 -1.442695, %v584_v57 }
 0x176   :  { %v580_v1 = vpop.permute.xlu1 %579 }
 0x177   :  { %717 = vpow2.f32 %v655_v0  ;;  %v585_v40 = vadd.f32 %v580_v1, %v567_v62  ;;  %v586_v2 = vadd.f32 %v580_v1, %v568_v63  ;;  %v587_v3 = vadd.f32 %v580_v1, %v569_v59 }
 0x178   :  { %719 = vpow2.f32 %v656_v39 }
 0x179   :  { %721 = vpow2.f32 %v657_v46  ;;  %v658_v33 = vmul.f32 -1.442695, %v585_v40  ;;  %v659_v61 = vmul.f32 -1.442695, %v586_v2  ;;  %v660_v4 = vmul.f32 -1.442695, %v587_v3 }
 0x17b   :  { %723 = vpow2.f32 %v658_v33 }
 0x17c   :  { %725 = vpow2.f32 %v659_v61 }
 0x17d   :  { %727 = vpow2.f32 %v660_v4 }
 0x181   :  { %v718_v5 = vpop.eup %717 }
 0x182   :  { %v720_v6 = vpop.eup %719  ;;  %v606_v7 = vadd.f32 1.0, %v718_v5 }
 0x183   :  { %v722_v47 = vpop.eup %721  ;;  %v607_v9 = vadd.f32 1.0, %v720_v6 }
 0x184   :  { %v608_v10 = vadd.f32 1.0, %v722_v47  ;;  %729 = vrcp.f32 %v606_v7 }
 0x185   :  { %v724_v8 = vpop.eup %723  ;;  %731 = vrcp.f32 %v607_v9 }
 0x186   :  { %v726_v14 = vpop.eup %725  ;;  %733 = vrcp.f32 %v608_v10  ;;  %v609_v48 = vadd.f32 1.0, %v724_v8 }
 0x187   :  { %v728_v15 = vpop.eup %727  ;;  %v610_v16 = vadd.f32 1.0, %v726_v14 }
 0x188   :  { %v611_v18 = vadd.f32 1.0, %v728_v15  ;;  %735 = vrcp.f32 %v609_v48 }
 0x189   :  { %737 = vrcp.f32 %v610_v16 }
 0x18a   :  { %739 = vrcp.f32 %v611_v18 }
 0x18e   :  { %v730_v19 = vpop.eup %729 }
 0x18f   :  { %v732_v20 = vpop.eup %731  ;;  %v624_v22 = vmul.f32 %v730_v19, %v582_v53 }
 0x190   :  { %v734_v23 = vpop.eup %733  ;;  %v625_v24 = vmul.f32 %v732_v20, %v583_v56 }
 0x191   :  { %v626_v11 = vmul.f32 %v734_v23, %v584_v57  ;;  %630 = vst [vmem:[#allocation2] sm:$0xff] %v624_v22 }
 0x192   :  { %v736_v25 = vpop.eup %735  ;;  %631 = vst [vmem:[#allocation2 + $0x8] sm:$0xff] %v625_v24 }
 0x193   :  { %v738_v26 = vpop.eup %737  ;;  %632 = vst [vmem:[#allocation2 + $0x10] sm:$0xff] %v626_v11  ;;  %v627_v51 = vmul.f32 %v736_v25, %v585_v40 }
 0x194   :  { %v740_v27 = vpop.eup %739  ;;  %v628_v54 = vmul.f32 %v738_v26, %v586_v2 }
 0x195   :  { %v629_v28 = vmul.f32 %v740_v27, %v587_v3  ;;  %633 = vst [vmem:[#allocation2 + $0x18] sm:$0xff] %v627_v51 }
 0x196   :  { %634 = vst [vmem:[#allocation2 + $0x20] sm:$0xff] %v628_v54 }
 0x197   :  { %635 = vst [vmem:[#allocation2 + $0x28] sm:$0xff] %v629_v28 }
 0x198   :  { %752 = shalt.err (!%p749_p4)
}
 0x199   :  { %s753_s20 = scalar_lea.hbm %s1032_s5, 768 }
 0x19a   :  { %p754_p5 = scmp.ne.s32.totalorder %s1032_s5, %s753_s20  ;;  %p757_p6 = scmp.lt.u32.totalorder %s753_s20, %s1032_s5 }
 0x19c   :  { %p759_p7 = pnand %p757_p6, %p754_p5 }
 0x19e   :  { %762 = shalt.err (!%p759_p7)
}
 0x19f   :  { %s783_s2 = smov 384   ;;  %s784_s25 = smov 24  }
 0x1a0   :  { %647 = dma.vmem_to_hbm [thread:$0]  %s642_s17, 768, %s1032_s5, [#allocation3], %s783_s2, %s783_s2, %s784_s25  }
 0x1a1   :  { %763 = dma.done.wait [#allocation3], 768  }
 0x1a2   :  { %764 = vsyncadd [#allocation3], 4294966528 }
 0x1a3   :  { %651 = vsyncpa [#allocation3], 1 }

</bundles_post_ra>
